<compile_context>
chip_gen: v6e
topology: v6e:2x2x1
jax: 0.10.0
libtpu: 0.0.40
codegen_flags: <defaults>
</compile_context>

<pallas_src>
import functools

import jax
import jax.numpy as jnp
from jax.experimental import pallas as pl
from jax.experimental.pallas import tpu as pltpu

LANE = 128          # lane width (f32)
SUBLANE = 8
C_PAD = 8           # classes padded 3 -> 8 (one sublane group)
NEG_INF = -1e30     # bias for fake classes: never wins max, exp() underflows to 0


def _round_up(x, m):
    return ((x + m - 1) // m) * m


def _rowmax(a):
    """Max over axis 0 (classes) of a (C, rt) array, unrolled (guaranteed lowering)."""
    m = a[0:1, :]
    for r in range(1, a.shape[0]):
        m = jnp.maximum(m, a[r:r + 1, :])
    return m


def _rowsum(a):
    """Sum over axis 0 (classes) of a (C, rt) array, unrolled (guaranteed lowering)."""
    s = a[0:1, :]
    for r in range(1, a.shape[0]):
        s = s + a[r:r + 1, :]
    return s


def _net_kernel(x_ref, wt_ref, b_ref, o_ref):
    # x: (rt, F)   wt: (C_PAD, F)   b: (C_PAD, 1)   o: (C_PAD, rt)
    # logits_T[c, n] = sum_d wt[c, d] * x[n, d]   (A @ B^T, contracting both last dims)
    logits = jax.lax.dot_general(
        wt_ref[...], x_ref[...],
        dimension_numbers=(((1,), (1,)), ((), ())),
        preferred_element_type=jnp.float32)
    logits = logits + b_ref[...]                      # lane-broadcast (C_PAD, 1)

    # Numerically stable log_softmax over the (small, sublane) class axis.
    m = _rowmax(logits)                               # (1, rt)
    shifted = logits - m                              # sublane-broadcast
    denom = _rowsum(jnp.exp(shifted))                 # (1, rt); fake rows contribute 0
    o_ref[...] = (shifted - jnp.log(denom)).astype(o_ref.dtype)


def prepare_params(weight, bias):
    """Pad PyTorch-layout Linear params once (outside the per-call path).

    weight: (out_features, in_features)   bias: (out_features,)
    Returns wt_pad (C_PAD, in_features), b_pad (C_PAD, 1).
    """
    out, f = weight.shape
    wt_pad = jnp.zeros((C_PAD, f), jnp.float32).at[:out].set(weight.astype(jnp.float32))
    b_pad = jnp.full((C_PAD, 1), NEG_INF, jnp.float32).at[:out, 0].set(
        bias.astype(jnp.float32))
    return wt_pad, b_pad


@functools.partial(jax.jit, static_argnames=("num_classes", "row_tile"))
def net_forward(x, wt_pad, b_pad, *, num_classes=3, row_tile=4096):
    """log_softmax(x @ W^T + b, axis=1) with W in PyTorch (out, in) layout."""
    B, F = x.shape
    C8 = wt_pad.shape[0]
    F_pad = _round_up(F, LANE)                        # x block is lane-padded in VMEM

    # --- corrected VMEM accounting (review: count round_up(F,128), not F) ----
    # Double-buffered x block + double-buffered (C8, rt) output block, per row.
    bytes_per_row = 2 * (F_pad * 4 + C8 * 4)
    vmem_budget = 24 << 20                            # safe even for v7x (32 MiB scoped)
    max_rt = max(LANE, (vmem_budget // bytes_per_row) // LANE * LANE)
    rt_cap = max(LANE, (min(row_tile, max_rt) // LANE) * LANE)

    # --- tile / grid selection with minimal batch padding ---------------------
    if B <= rt_cap:
        # Single tile: block == full array, no batch padding at all.
        rt, Bp, grid_n = B, B, 1
        x_p = x
    else:
        grid_n = -(-B // rt_cap)                      # cdiv -> >= 2, good for v7x 2 TCs
        rt = _round_up(-(-B // grid_n), LANE)         # near-even tiles, multiple of 128
        Bp = rt * grid_n                              # <= 127 pad rows per tile
        x_p = jnp.pad(x, ((0, Bp - B), (0, 0)))

    needed = (2 * _round_up(rt, SUBLANE) * (F_pad * 4 + C8 * 4)
              + 2 * C8 * F_pad * 4 + (1 << 16))
    vmem_limit = int(max(needed + (2 << 20), 8 << 20))

    out_t = pl.pallas_call(
        _net_kernel,
        out_shape=jax.ShapeDtypeStruct((C8, Bp), jnp.float32),
        grid_spec=pltpu.PrefetchScalarGridSpec(
            num_scalar_prefetch=0,
            grid=(grid_n,),
            in_specs=[
                pl.BlockSpec((rt, F), lambda i: (i, 0)),    # x tile per step
                pl.BlockSpec((C8, F), lambda i: (0, 0)),    # weight, grid-invariant
                pl.BlockSpec((C8, 1), lambda i: (0, 0)),    # bias, grid-invariant
            ],
            out_specs=pl.BlockSpec((C8, rt), lambda i: (0, i)),   # batch on lanes
        ),
        compiler_params=pltpu.CompilerParams(
            # "parallel" so v7x's two TensorCores can each take half the grid.
            # TODO(synk): if plain PARALLEL doesn't shard on v7x hardware, switch
            # this axis to pltpu.CORE_PARALLEL after verifying on-chip.
            dimension_semantics=("parallel",),
            vmem_limit_bytes=vmem_limit,
        ),
    )(x_p, wt_pad, b_pad)

    # Drop the 5 fake classes and any batch padding; tiny (3, B) slice + transpose.
    return out_t[:num_classes, :B].T


def reference_forward(x, weight, bias):
    logits = x @ weight.T + bias[None, :]
    return jax.nn.log_softmax(logits, axis=1)


if __name__ == "__main__":
    key = jax.random.PRNGKey(0)
    k_x, k_w, k_b, k_x2 = jax.random.split(key, 4)

    input_features = 32
    out_features = 3  # matches nn.Linear(input_features, 3)

    # Deterministic synthetic params in PyTorch nn.Linear layout (out, in).
    bound = 1.0 / (input_features ** 0.5)
    weight = jax.random.uniform(
        k_w, (out_features, input_features), minval=-bound, maxval=bound,
        dtype=jnp.float32)
    bias = jax.random.uniform(
        k_b, (out_features,), minval=-bound, maxval=bound, dtype=jnp.float32)

    # Padding hoisted out of the per-call path (done once).
    wt_pad, b_pad = prepare_params(weight, bias)

    # --- small case (module's expected tiny input): single tile, no padding ---
    batch = 8
    x = jax.random.normal(k_x, (batch, input_features), dtype=jnp.float32)
    y = jax.block_until_ready(net_forward(x, wt_pad, b_pad, num_classes=out_features))
    y_ref = reference_forward(x, weight, bias)
    assert y.shape == (batch, out_features)
    assert jnp.allclose(y, y_ref, atol=1e-5, rtol=1e-5), "small-batch mismatch"

    # --- gridded case: forces multi-tile path (grid=3, 128-row tiles, padding) --
    batch2 = 300
    x2 = jax.random.normal(k_x2, (batch2, input_features), dtype=jnp.float32)
    y2 = jax.block_until_ready(
        net_forward(x2, wt_pad, b_pad, num_classes=out_features, row_tile=128))
    y2_ref = reference_forward(x2, weight, bias)
    assert y2.shape == (batch2, out_features)
    assert jnp.allclose(y2, y2_ref, atol=1e-5, rtol=1e-5), "gridded mismatch"

    print("KERNEL_OK")
</pallas_src>

<mosaic_0001>
module attributes {stable_mosaic.version = 11 : i64} {
  func.func @_net_kernel(%arg0: i32, %arg1: memref<8x32xf32, #tpu.memory_space<vmem>>, %arg2: memref<8x32xf32, #tpu.memory_space<vmem>>, %arg3: memref<8x1xf32, #tpu.memory_space<vmem>>, %arg4: memref<8x8xf32, #tpu.memory_space<vmem>>) attributes {dimension_semantics = [#tpu.dimension_semantics<parallel>], iteration_bounds = array<i64: 1>, scalar_prefetch = 0 : i64, scratch_operands = 0 : i64, tpu.core_type = #tpu.core_type<tc>, window_params = [{transform_indices = @transform_0, window_bounds = array<i64: 8, 32>}, {pipeline_mode = #tpu.pipeline_mode<synchronous>, transform_indices = @transform_1, window_bounds = array<i64: 8, 32>}, {pipeline_mode = #tpu.pipeline_mode<synchronous>, transform_indices = @transform_2, window_bounds = array<i64: 8, 1>}, {transform_indices = @transform_3, window_bounds = array<i64: 8, 8>}]} {
    %c0 = arith.constant 0 : index
    %c0_0 = arith.constant 0 : index
    %0 = vector.load %arg2[%c0, %c0_0] : memref<8x32xf32, #tpu.memory_space<vmem>>, vector<8x32xf32>
    %c0_1 = arith.constant 0 : index
    %c0_2 = arith.constant 0 : index
    %1 = vector.load %arg1[%c0_1, %c0_2] : memref<8x32xf32, #tpu.memory_space<vmem>>, vector<8x32xf32>
    %cst = arith.constant dense<0.000000e+00> : vector<8x8xf32>
    %2 = tpu.matmul %0, %1, %cst {dimension_numbers = #tpu.dot_dimension_numbers<[1], [1], [0], [0], [0, 0, 1, 0], [], []>} : vector<8x32xf32>, vector<8x32xf32>, vector<8x8xf32> -> vector<8x8xf32>
    %c0_3 = arith.constant 0 : index
    %c0_4 = arith.constant 0 : index
    %3 = vector.load %arg3[%c0_3, %c0_4] : memref<8x1xf32, #tpu.memory_space<vmem>>, vector<8x1xf32>
    %4 = vector.broadcast %3 : vector<8x1xf32> to vector<8x8xf32>
    %5 = arith.addf %2, %4 : vector<8x8xf32>
    %6 = vector.extract_strided_slice %5 {offsets = [0, 0], sizes = [1, 8], strides = [1, 1]} : vector<8x8xf32> to vector<1x8xf32>
    %7 = vector.extract_strided_slice %5 {offsets = [1, 0], sizes = [1, 8], strides = [1, 1]} : vector<8x8xf32> to vector<1x8xf32>
    %8 = arith.maximumf %6, %7 : vector<1x8xf32>
    %9 = vector.extract_strided_slice %5 {offsets = [2, 0], sizes = [1, 8], strides = [1, 1]} : vector<8x8xf32> to vector<1x8xf32>
    %10 = arith.maximumf %8, %9 : vector<1x8xf32>
    %11 = vector.extract_strided_slice %5 {offsets = [3, 0], sizes = [1, 8], strides = [1, 1]} : vector<8x8xf32> to vector<1x8xf32>
    %12 = arith.maximumf %10, %11 : vector<1x8xf32>
    %13 = vector.extract_strided_slice %5 {offsets = [4, 0], sizes = [1, 8], strides = [1, 1]} : vector<8x8xf32> to vector<1x8xf32>
    %14 = arith.maximumf %12, %13 : vector<1x8xf32>
    %15 = vector.extract_strided_slice %5 {offsets = [5, 0], sizes = [1, 8], strides = [1, 1]} : vector<8x8xf32> to vector<1x8xf32>
    %16 = arith.maximumf %14, %15 : vector<1x8xf32>
    %17 = vector.extract_strided_slice %5 {offsets = [6, 0], sizes = [1, 8], strides = [1, 1]} : vector<8x8xf32> to vector<1x8xf32>
    %18 = arith.maximumf %16, %17 : vector<1x8xf32>
    %19 = vector.extract_strided_slice %5 {offsets = [7, 0], sizes = [1, 8], strides = [1, 1]} : vector<8x8xf32> to vector<1x8xf32>
    %20 = arith.maximumf %18, %19 : vector<1x8xf32>
    %21 = vector.broadcast %20 : vector<1x8xf32> to vector<8x8xf32>
    %22 = arith.subf %5, %21 : vector<8x8xf32>
    %23 = math.exp %22 : vector<8x8xf32>
    %24 = vector.extract_strided_slice %23 {offsets = [0, 0], sizes = [1, 8], strides = [1, 1]} : vector<8x8xf32> to vector<1x8xf32>
    %25 = vector.extract_strided_slice %23 {offsets = [1, 0], sizes = [1, 8], strides = [1, 1]} : vector<8x8xf32> to vector<1x8xf32>
    %26 = arith.addf %24, %25 : vector<1x8xf32>
    %27 = vector.extract_strided_slice %23 {offsets = [2, 0], sizes = [1, 8], strides = [1, 1]} : vector<8x8xf32> to vector<1x8xf32>
    %28 = arith.addf %26, %27 : vector<1x8xf32>
    %29 = vector.extract_strided_slice %23 {offsets = [3, 0], sizes = [1, 8], strides = [1, 1]} : vector<8x8xf32> to vector<1x8xf32>
    %30 = arith.addf %28, %29 : vector<1x8xf32>
    %31 = vector.extract_strided_slice %23 {offsets = [4, 0], sizes = [1, 8], strides = [1, 1]} : vector<8x8xf32> to vector<1x8xf32>
    %32 = arith.addf %30, %31 : vector<1x8xf32>
    %33 = vector.extract_strided_slice %23 {offsets = [5, 0], sizes = [1, 8], strides = [1, 1]} : vector<8x8xf32> to vector<1x8xf32>
    %34 = arith.addf %32, %33 : vector<1x8xf32>
    %35 = vector.extract_strided_slice %23 {offsets = [6, 0], sizes = [1, 8], strides = [1, 1]} : vector<8x8xf32> to vector<1x8xf32>
    %36 = arith.addf %34, %35 : vector<1x8xf32>
    %37 = vector.extract_strided_slice %23 {offsets = [7, 0], sizes = [1, 8], strides = [1, 1]} : vector<8x8xf32> to vector<1x8xf32>
    %38 = arith.addf %36, %37 : vector<1x8xf32>
    %39 = math.log %38 : vector<1x8xf32>
    %40 = vector.broadcast %39 : vector<1x8xf32> to vector<8x8xf32>
    %41 = arith.subf %22, %40 : vector<8x8xf32>
    %c0_5 = arith.constant 0 : index
    %c0_6 = arith.constant 0 : index
    %42 = vector.load %arg4[%c0_5, %c0_6] : memref<8x8xf32, #tpu.memory_space<vmem>>, vector<8x8xf32>
    tpu.vector_store %arg4[%c0_5, %c0_6], %41 {strides = array<i32>} : memref<8x8xf32, #tpu.memory_space<vmem>>, vector<8x8xf32>,
    return
  }
  func.func @transform_0(%arg0: i32) -> (i32, i32) {
    %c0_i32 = arith.constant 0 : i32
    %c0_i32_0 = arith.constant 0 : i32
    return %arg0, %c0_i32 : i32, i32
  }
  func.func @transform_1(%arg0: i32) -> (i32, i32) {
    %c0_i32 = arith.constant 0 : i32
    %c0_i32_0 = arith.constant 0 : i32
    %c0_i32_1 = arith.constant 0 : i32
    return %c0_i32, %c0_i32_0 : i32, i32
  }
  func.func @transform_2(%arg0: i32) -> (i32, i32) {
    %c0_i32 = arith.constant 0 : i32
    %c0_i32_0 = arith.constant 0 : i32
    %c0_i32_1 = arith.constant 0 : i32
    return %c0_i32, %c0_i32_0 : i32, i32
  }
  func.func @transform_3(%arg0: i32) -> (i32, i32) {
    %c0_i32 = arith.constant 0 : i32
    %c0_i32_0 = arith.constant 0 : i32
    return %c0_i32, %arg0 : i32, i32
  }
}

</mosaic_0001>

<bundles_post_ra>
// kernel: net_forward.1
= control target key start
LH: loop header
LB: loop body
LE: loop exit
PB: predicated region body
PF: predicated region fallthrough
CT: control target
= control target key end

     0   :  { %8 = vsyncpa [#allocation3], 0  ;;  %s216_s12 = smov [#allocation2]   ;;  %s252_s0 = inlined_call_operand.vmem [shape: f32[8,32], index: 0, kind: input, shape index: {}]   ;;  %s253_s1 = inlined_call_operand.hbm [shape: f32[8,32], index: 1, kind: input, shape index: {}]   ;;  %s254_s2 = inlined_call_operand.vmem [shape: f32[8,1], index: 2, kind: input, shape index: {}]   ;;  %s255_s3 = inlined_call_operand.vmem [shape: f32[8,8], index: 3, kind: output, shape index: {}]  }
   0x1   :  { %s17_s13 = sshll.u32 %s216_s12, 4  ;;  %s18_s13 = int_to_ptr.vmem [resolvable:$true] %s17_s13 }
   0x2   :  { %s202_s14 = scalar_lea.vmem %s18_s13, 128  ;;  %p207_p1 = scmp.lt.s32.totalorder %s18_s13, %s18_s13 }
   0x3   :  { %p203_p0 = scmp.ne.s32.totalorder %s18_s13, %s202_s14  ;;  %p208_p2 = scmp.lt.s32.totalorder %s202_s14, %s202_s14 }
   0x5   :  { %p209_p3 = por %p208_p2, %p207_p1 }
   0x7   :  { %p210_p4 = pnand %p209_p3, %p203_p0 }
   0x9   :  { %213 = shalt.err (!%p210_p4)
}
   0xa   :  { %20 = dma.hbm_to_vmem [thread:$0]  %s253_s1, 128, %s18_s13, [#allocation3]  }
   0xb   :  { %214 = dma.done.wait [#allocation3], 128  }
   0xc   :  { %215 = vsyncadd [#allocation3], 4294967168  ;;  %v217_v0 = vmov 0.0   ;;  %vm218_vm0 = vmmov 0   ;;  %v219_v1 = vmov 0   ;;  %vm34_vm1 = vcmask 261120  }
   0xd   :  { %180 = vmatprep.subr.mxu0 %v217_v0  ;;  %182 = vmatprep.mubr.msk.f32.mxu0 %vm218_vm0, %v217_v0  ;;  %v27_v2 = vld [vmem:[%s252_s0] sm:$0xff]  ;;  %v133_v14 = vlaneseq  ;;  %vm169_vm2 = vcmask 64512  }
   0xe   :  { %189 = vset.pattern.permute.xlu0 %v219_v1  ;;  %v28_v3 = vld [vmem:[%s254_s2] sm:$0xff]  ;;  %181 = vmatpush3.xpose.msk.msra.mxu0 %vm34_vm1, %v27_v2 }
   0xf   :  { %v26_v4 = vld [vmem:[#allocation2] sm:$0xff]  ;;  %31 = vperm.xlu0 %189, %v28_v3   ;;  %v134_v19 = vshrl.u32 %v133_v14, 7 }
  0x11   :  { %183 = vmatmul.mubr.msk.f32.vlgmr.msra.gmra.mxu0 %vm34_vm1, %v26_v4  ;;  %v135_v24 = vsub.s32 0, %v134_v19 }
  0x8a   :  { %v32_v5 = vpop.permute.xlu0 %31 }
  0xd1   :  { %v107_v6 = vpop.f32.mrf.mxu0 }
  0xd2   :  { %v108_v7 = vadd.f32 %v107_v6, %v32_v5 }
  0xd3   :  { %v184_v8 = vpop.f32.mrf.mxu0 }
  0xd4   :  { %v112_v9 = vrot.slane %v108_v7, 1  ;;  %v115_v11 = vrot.slane %v108_v7, 2  ;;  %v118_v13 = vrot.slane %v108_v7, 3  ;;  %v121_v16 = vrot.slane %v108_v7, 4 }
  0xd5   :  { %v124_v18 = vrot.slane %v108_v7, 5  ;;  %v127_v21 = vrot.slane %v108_v7, 6  ;;  %v130_v23 = vrot.slane %v108_v7, 7 }
  0xd6   :  { %v114_v10 = vmax.f32 %v108_v7, %v112_v9 }
  0xd8   :  { %v117_v12 = vmax.f32 %v114_v10, %v115_v11 }
  0xda   :  { %v120_v15 = vmax.f32 %v117_v12, %v118_v13 }
  0xdc   :  { %v123_v17 = vmax.f32 %v120_v15, %v121_v16 }
  0xde   :  { %v126_v20 = vmax.f32 %v123_v17, %v124_v18 }
  0xe0   :  { %v129_v22 = vmax.f32 %v126_v20, %v127_v21 }
  0xe2   :  { %v132_v25 = vmax.f32 %v129_v22, %v130_v23 }
  0xe4   :  { %v136_v26 = vrot.slane %v132_v25, %v135_v24 }
  0xe6   :  { %v137_v27 = vsub.f32 %v108_v7, %v136_v26 }
  0xe8   :  { %v138_v28 = vmul.f32 1.442695, %v137_v27 }
  0xea   :  { %190 = vpow2.f32 %v138_v28 }
  0xf7   :  { %v191_v29 = vpop.eup %190 }
  0xf8   :  { %v141_v30 = vrot.slane %v191_v29, 1  ;;  %v144_v32 = vrot.slane %v191_v29, 2  ;;  %v147_v34 = vrot.slane %v191_v29, 3  ;;  %v150_v36 = vrot.slane %v191_v29, 4 }
  0xf9   :  { %v153_v38 = vrot.slane %v191_v29, 5  ;;  %v156_v40 = vrot.slane %v191_v29, 6  ;;  %v159_v42 = vrot.slane %v191_v29, 7 }
  0xfa   :  { %v143_v31 = vadd.f32 %v191_v29, %v141_v30 }
  0xfc   :  { %v146_v33 = vadd.f32 %v144_v32, %v143_v31 }
  0xfe   :  { %v149_v35 = vadd.f32 %v147_v34, %v146_v33 }
 0x100   :  { %v152_v37 = vadd.f32 %v150_v36, %v149_v35 }
 0x102   :  { %v155_v39 = vadd.f32 %v153_v38, %v152_v37 }
 0x104   :  { %v158_v41 = vadd.f32 %v156_v40, %v155_v39 }
 0x106   :  { %v161_v43 = vadd.f32 %v159_v42, %v158_v41 }
 0x108   :  { %192 = vlog2.f32 %v161_v43 }
 0x115   :  { %v193_v44 = vpop.eup %192 }
 0x116   :  { %v163_v45 = vmul.f32 0.6931472, %v193_v44 }
 0x118   :  { %v167_v46 = vrot.slane %v163_v45, %v135_v24 }
 0x11a   :  { %v168_v47 = vsub.f32 %v137_v27, %v167_v46 }
 0x11c   :  { %170 = vst.msk [vmem:[%s255_s3] sm:$0xff] %vm169_vm2, %v168_v47 }
 0x11d   :  { %175 = vsyncpa [#allocation3], 1 }

</bundles_post_ra>
